<compile_context>
chip_gen: v5e
topology: v5e:2x2
jax: 0.10.0
libtpu: 0.0.40
codegen_flags: <defaults>
</compile_context>

<pallas_src>
import jax
import jax.numpy as jnp
from jax.experimental import pallas as pl
from jax.experimental.pallas import tpu as pltpu


# ---------------------------------------------------------------------------
# Kernels (flattened 2-D layout: rows = B*C, lanes = H*W)
# ---------------------------------------------------------------------------

def _fwa_add_kernel(x_ref, emb_ref, o_ref):
    # x_ref: (T_BC, T_HW)   emb_ref: (T_BC, 1) f32   o_ref: (T_BC, T_HW)
    x = x_ref[...].astype(jnp.float32)
    o_ref[...] = (x + emb_ref[...]).astype(o_ref.dtype)


def _fwa_affine_kernel(x_ref, gb_ref, o_ref):
    # gb_ref: (2, T_BC, 1) f32; row 0 = (1 + gamma) [the +1 is pre-folded],
    # row 1 = beta.  out = gamma * x + beta  — a single broadcast FMA.
    x = x_ref[...].astype(jnp.float32)
    gamma = gb_ref[0]                     # (T_BC, 1)
    beta = gb_ref[1]                      # (T_BC, 1)
    o_ref[...] = (gamma * x + beta).astype(o_ref.dtype)


# ---------------------------------------------------------------------------
# Tiling helpers
# ---------------------------------------------------------------------------

def _vmem_budget_and_limit():
    """Generation-aware VMEM sizing: ~1/2 of physical VMEM for the 4 resident
    streaming tiles, ~3/4 as the scoped compiler limit."""
    cap = 64 * 1024 * 1024          # conservative default: v7x per-TC VMEM
    try:
        info = pltpu.get_tpu_info()
        cap = int(getattr(info, "vmem_capacity_bytes", cap))
    except Exception:
        pass
    budget = cap // 2
    limit = max(budget + 16 * 1024 * 1024, (3 * cap) // 4)
    limit = min(limit, cap - 4 * 1024 * 1024)
    return budget, limit


def _choose_tiles(BC, HW, itemsize, vmem_budget_bytes):
    """Pick a (t_bc, t_hw) block for the flattened (B*C, HW) problem.

    t_hw is a multiple of 128 lanes (or the full HW), t_bc a multiple of 8
    sublanes (or the full BC).  The 4 resident streaming tiles (double-buffered
    input + double-buffered output, in the *input* dtype) must fit the budget.
    """
    max_tile_bytes = max(vmem_budget_bytes // 4, 8 * 128 * itemsize)
    # Lane axis first: widest tile affordable at the minimal 8-row sublane tile.
    max_lanes = max(128, max_tile_bytes // (8 * itemsize))
    if HW <= max_lanes:
        t_hw = HW                        # whole spatial extent in one tile
    else:
        t_hw = (max_lanes // 128) * 128
    # Then grow the sublane axis with what is left of the per-tile budget.
    max_rows = max(8, max_tile_bytes // (max(t_hw, 1) * itemsize))
    if BC <= max_rows:
        t_bc = BC                        # whole flattened-channel extent
    else:
        t_bc = (max_rows // 8) * 8
    return t_bc, t_hw


def _even_steps_t_hw(BC, HW, t_bc, t_hw):
    """Best-effort v7x megacore tweak: if the total number of parallel grid
    steps is odd (>1), shrink the lane tile (never below half its size / 128
    lanes) so the step count becomes even and both TensorCores stay busy."""
    n_bc = -(-BC // t_bc)
    n_hw = -(-HW // t_hw)
    total = n_bc * n_hw
    if total == 1 or total % 2 == 0:
        return t_hw
    floor = max(128, ((t_hw // 2) // 128) * 128)
    cand = (min(t_hw, HW) // 128) * 128
    while cand >= floor:
        if (n_bc * (-(-HW // cand))) % 2 == 0:
            return cand
        cand -= 128
    return t_hw


# ---------------------------------------------------------------------------
# Wrapper
# ---------------------------------------------------------------------------

def feature_wise_affine(x, type_embed, weight, bias, use_affine_level=False,
                        donate_x=False):
    """x: (B, C, H, W) NCHW; type_embed: (B, Cin);
    weight: (C*(1+affine), Cin) [torch nn.Linear layout]; bias: (C*(1+affine),).

    Note: the tiny Linear and gamma/beta are computed once in f32 in the
    wrapper (may differ in the last ulp from a bf16 PyTorch Linear)."""
    B, C, H, W = x.shape
    HW = H * W
    BC = B * C
    x2 = x.reshape(BC, HW)               # pure bitcast view (row-major NCHW)

    # Hoisted Linear (tiny matvec per batch) — once, in f32, in the wrapper.
    emb = (jnp.dot(type_embed.astype(jnp.float32), weight.astype(jnp.float32).T)
           + bias.astype(jnp.float32))   # (B, C*(1+affine)) f32

    vmem_budget, vmem_limit = _vmem_budget_and_limit()
    t_bc, t_hw = _choose_tiles(BC, HW, x.dtype.itemsize, vmem_budget)
    t_hw = _even_steps_t_hw(BC, HW, t_bc, t_hw)
    n_bc = pl.cdiv(BC, t_bc)
    n_hw = pl.cdiv(HW, t_hw)

    x_spec = pl.BlockSpec((t_bc, t_hw), lambda i, t: (i, t))
    out_spec = pl.BlockSpec((t_bc, t_hw), lambda i, t: (i, t))

    compiler_params = pltpu.CompilerParams(
        dimension_semantics=("parallel", "parallel"),
        vmem_limit_bytes=vmem_limit,
    )
    # x2 -> out2 aliasing only when the caller actually donates x.
    io_aliases = {0: 0} if donate_x else {}

    if use_affine_level:
        assert weight.shape[0] == 2 * C
        gamma = (emb[:, :C] + 1.0).reshape(BC, 1)     # fold +1: out = gamma*x+beta
        beta = emb[:, C:].reshape(BC, 1)
        gb = jnp.stack([gamma, beta], axis=0)         # (2, BC, 1) — one operand
        gb_spec = pl.BlockSpec((2, t_bc, 1), lambda i, t: (0, i, 0))
        cost = pl.CostEstimate(
            flops=2 * BC * HW,
            transcendentals=0,
            bytes_accessed=2 * BC * HW * x.dtype.itemsize + 2 * BC * 4,
        )
        out2 = pl.pallas_call(
            _fwa_affine_kernel,
            out_shape=jax.ShapeDtypeStruct((BC, HW), x.dtype),
            grid_spec=pltpu.PrefetchScalarGridSpec(
                num_scalar_prefetch=0,
                grid=(n_bc, n_hw),
                in_specs=[x_spec, gb_spec],
                out_specs=out_spec,
            ),
            compiler_params=compiler_params,
            cost_estimate=cost,
            input_output_aliases=io_aliases,
        )(x2, gb)
    else:
        assert weight.shape[0] == C
        emb2 = emb.reshape(BC, 1)
        e_spec = pl.BlockSpec((t_bc, 1), lambda i, t: (i, 0))
        cost = pl.CostEstimate(
            flops=BC * HW,
            transcendentals=0,
            bytes_accessed=2 * BC * HW * x.dtype.itemsize + BC * 4,
        )
        out2 = pl.pallas_call(
            _fwa_add_kernel,
            out_shape=jax.ShapeDtypeStruct((BC, HW), x.dtype),
            grid_spec=pltpu.PrefetchScalarGridSpec(
                num_scalar_prefetch=0,
                grid=(n_bc, n_hw),
                in_specs=[x_spec, e_spec],
                out_specs=out_spec,
            ),
            compiler_params=compiler_params,
            cost_estimate=cost,
            input_output_aliases=io_aliases,
        )(x2, emb2)

    return out2.reshape(B, C, H, W)


# ---------------------------------------------------------------------------
# Reference + self-test
# ---------------------------------------------------------------------------

def _reference(x, type_embed, weight, bias, use_affine_level):
    B, C, H, W = x.shape
    emb = type_embed @ weight.T + bias  # (B, out)
    if use_affine_level:
        gamma = emb[:, :C].reshape(B, C, 1, 1)
        beta = emb[:, C:].reshape(B, C, 1, 1)
        return (1.0 + gamma) * x + beta
    return x + emb.reshape(B, C, 1, 1)


if __name__ == "__main__":
    B, C, H, W = 2, 4, 16, 16
    Cin = 32  # in_channels of the Linear (type-embedding dim)

    key = jax.random.PRNGKey(0)
    kx, kt, kw1, kb1, kw2, kb2 = jax.random.split(key, 6)

    x = jax.random.normal(kx, (B, C, H, W), dtype=jnp.float32)
    type_embed = jax.random.normal(kt, (B, Cin), dtype=jnp.float32)

    # --- use_affine_level = False (module default): Linear(Cin -> C) ---
    w_add = jax.random.normal(kw1, (C, Cin), dtype=jnp.float32) * 0.1
    b_add = jax.random.normal(kb1, (C,), dtype=jnp.float32) * 0.1
    out_add = feature_wise_affine(x, type_embed, w_add, b_add, use_affine_level=False)
    out_add = jax.block_until_ready(out_add)
    ref_add = _reference(x, type_embed, w_add, b_add, False)
    assert jnp.allclose(out_add, ref_add, atol=1e-5, rtol=1e-5)

    # --- use_affine_level = True: Linear(Cin -> 2*C), (1+gamma)*x + beta ---
    w_aff = jax.random.normal(kw2, (2 * C, Cin), dtype=jnp.float32) * 0.1
    b_aff = jax.random.normal(kb2, (2 * C,), dtype=jnp.float32) * 0.1
    out_aff = feature_wise_affine(x, type_embed, w_aff, b_aff, use_affine_level=True)
    out_aff = jax.block_until_ready(out_aff)
    ref_aff = _reference(x, type_embed, w_aff, b_aff, True)
    assert jnp.allclose(out_aff, ref_aff, atol=1e-5, rtol=1e-5)

    print("KERNEL_OK")
</pallas_src>

<mosaic_0001>
module attributes {stable_mosaic.version = 11 : i64} {
  func.func @_fwa_add_kernel(%arg0: i32, %arg1: i32, %arg2: memref<8x256xf32, #tpu.memory_space<vmem>>, %arg3: memref<8x1xf32, #tpu.memory_space<vmem>>, %arg4: memref<8x256xf32, #tpu.memory_space<vmem>>) attributes {dimension_semantics = [#tpu.dimension_semantics<parallel>, #tpu.dimension_semantics<parallel>], iteration_bounds = array<i64: 1, 1>, scalar_prefetch = 0 : i64, scratch_operands = 0 : i64, tpu.core_type = #tpu.core_type<tc>, window_params = [{transform_indices = @transform_0, window_bounds = array<i64: 8, 256>}, {transform_indices = @transform_1, window_bounds = array<i64: 8, 1>}, {transform_indices = @transform_2, window_bounds = array<i64: 8, 256>}]} {
    %c0 = arith.constant 0 : index
    %c0_0 = arith.constant 0 : index
    %0 = vector.load %arg2[%c0, %c0_0] : memref<8x256xf32, #tpu.memory_space<vmem>>, vector<8x256xf32>
    %c0_1 = arith.constant 0 : index
    %c0_2 = arith.constant 0 : index
    %1 = vector.load %arg3[%c0_1, %c0_2] : memref<8x1xf32, #tpu.memory_space<vmem>>, vector<8x1xf32>
    %2 = vector.broadcast %1 : vector<8x1xf32> to vector<8x256xf32>
    %3 = arith.addf %0, %2 : vector<8x256xf32>
    %c0_3 = arith.constant 0 : index
    %c0_4 = arith.constant 0 : index
    %4 = vector.load %arg4[%c0_3, %c0_4] : memref<8x256xf32, #tpu.memory_space<vmem>>, vector<8x256xf32>
    tpu.vector_store %arg4[%c0_3, %c0_4], %3 {strides = array<i32>} : memref<8x256xf32, #tpu.memory_space<vmem>>, vector<8x256xf32>,
    return
  }
  func.func @transform_0(%arg0: i32, %arg1: i32) -> (i32, i32) {
    %c0_i32 = arith.constant 0 : i32
    return %arg0, %arg1 : i32, i32
  }
  func.func @transform_1(%arg0: i32, %arg1: i32) -> (i32, i32) {
    %c0_i32 = arith.constant 0 : i32
    %c0_i32_0 = arith.constant 0 : i32
    return %arg0, %c0_i32 : i32, i32
  }
  func.func @transform_2(%arg0: i32, %arg1: i32) -> (i32, i32) {
    %c0_i32 = arith.constant 0 : i32
    return %arg0, %arg1 : i32, i32
  }
}

</mosaic_0001>

<bundles_post_ra>
// kernel: tpu_custom_call.1
= control target key start
LH: loop header
LB: loop body
LE: loop exit
PB: predicated region body
PF: predicated region fallthrough
CT: control target
= control target key end

     0   :  { %7 = vsyncpa [#allocation3], 0  ;;  %s138_s0 = inlined_call_operand.hbm [shape: f32[8,256], index: 0, kind: input, shape index: {}]   ;;  %s139_s1 = inlined_call_operand.vmem [shape: f32[8,1], index: 1, kind: input, shape index: {}]   ;;  %s140_s2 = inlined_call_operand.hbm [shape: f32[8,256], index: 2, kind: output, shape index: {}]  }
   0x1   :  { %8 = vsyncpa [#allocation4], 0  ;;  %s14_s11 = sshll.u32 %s138_s0, 4  ;;  %s111_s12 = smov [#allocation2]   ;;  %s15_s11 = int_to_ptr.hbm [resolvable:$true] %s14_s11 }
   0x2   :  { %s16_s13 = sshll.u32 %s111_s12, 4  ;;  %s17_s13 = int_to_ptr.vmem [resolvable:$true] %s16_s13 }
   0x3   :  { %19 = dma.hbm_to_vmem [thread:$0]  %s15_s11, 256, %s17_s13, [#allocation3]  }
   0x4   :  { %107 = dma.done.wait [#allocation3], 256  }
   0x5   :  { %108 = vsyncadd [#allocation3], 4294967040  ;;  %v112_v0 = vmov 0   ;;  %v28_v1 = vld [vmem:[%s139_s1] sm:$0xff]  ;;  %v27_v3 = vld [vmem:[#allocation2 + $0x8] sm:$0xff]  ;;  %s113_s16 = smov [#allocation5]  }
   0x6   :  { %58 = vset.pattern.permute.xlu0 %v112_v0  ;;  %v26_v2 = vld [vmem:[#allocation2] sm:$0xff]  ;;  %s43_s17 = sshll.u32 %s113_s16, 4  ;;  %s45_s19 = sshll.u32 %s140_s2, 4  ;;  %s44_s17 = int_to_ptr.vmem [resolvable:$true] %s43_s17  ;;  %s46_s19 = int_to_ptr.hbm [resolvable:$true] %s45_s19 }
   0x7   :  { %31 = vperm.xlu0 %58, %v28_v1  }
  0x79   :  { %v32_v4 = vpop.permute.xlu0 %31 }
  0x7a   :  { %v34_v5 = vadd.f32 %v32_v4, %v26_v2  ;;  %v35_v6 = vadd.f32 %v32_v4, %v27_v3 }
  0x7c   :  { %36 = vst [vmem:[#allocation5] sm:$0xff] %v34_v5 }
  0x7d   :  { %37 = vst [vmem:[#allocation5 + $0x8] sm:$0xff] %v35_v6 }
  0x7e   :  { %48 = dma.vmem_to_hbm [thread:$0]  %s44_s17, 256, %s46_s19, [#allocation4]  }
  0x7f   :  { %109 = dma.done.wait [#allocation4], 256  }
  0x80   :  { %110 = vsyncadd [#allocation4], 4294967040 }
  0x81   :  { %53 = vsyncpa [#allocation3], 1 }
  0x82   :  { %54 = vsyncpa [#allocation4], 1 }

</bundles_post_ra>
